<compile_context>
chip_gen: v5e
topology: v5e:2x2
jax: 0.10.0
libtpu: 0.0.40
codegen_flags: <defaults>
</compile_context>

<pallas_src>
import math
from functools import partial

import jax
import jax.numpy as jnp
from jax.experimental import pallas as pl
from jax.experimental.pallas import tpu as pltpu

_SILU_NORM = 1.6790  # e3nn normalize2mom(silu) constant ~ (E[silu(N(0,1))^2])^-1/2


def _round_up(x, m):
    return ((x + m - 1) // m) * m


def _outer_concat(x, a):
    """(n, U), (n, V) -> (n, V*U) with lane blocks [a[:,0]*x | a[:,1]*x | ...]."""
    v_dim = a.shape[1]
    return jnp.concatenate([x * a[:, v:v + 1] for v in range(v_dim)], axis=-1)


# ------------------------------- Pallas kernel ------------------------------- #

def _conv_kernel(emb_ref, w0_ref, w1_ref, x_ref, attr_ref,
                 wsc_ref, wl1_ref, wl2_ref, src_ref, dst_ref, ea_ref,
                 o_ref, s_sc, x1_sc, acc_sc,
                 *, inv_sqrt_nn, c_s, c_x):
    """Fully fused scalar-irreps Convolution forward.

    Grid axis 0 iterates over edge tiles ("arbitrary": carries the accumulator and
    the prologue/epilogue phases).  All node-sized tensors stay resident in VMEM.

      pid == 0    : sc + lin1 FCTPs (shared x⊗attr expansion, 2 MXU matmuls),
                    zero the scatter accumulator.
      every step  : radial MLP -> per-edge TP weights; one-hot gather of
                    lin1(x)[edge_src] on the MXU; 'uvu' scalar TP; one-hot
                    scatter-add over edge_dst (edge_attr and 1/sqrt(num_neighbors)
                    folded into the scatter matrix).
      pid == last : lin2 FCTP on the aggregate + sin/cos combine -> output.
    """
    # ---- prologue: node-side FCTPs (sc, lin1) + accumulator init -------------
    @pl.when(pl.program_id(0) == 0)
    def _():
        x2 = _outer_concat(x_ref[...], attr_ref[...])                      # (N, V*U)
        s_sc[...] = jnp.dot(x2, wsc_ref[...], preferred_element_type=jnp.float32)
        x1_sc[...] = jnp.dot(x2, wl1_ref[...], preferred_element_type=jnp.float32)
        acc_sc[...] = jnp.zeros_like(acc_sc)

    # ---- edge phase (every grid step) ----------------------------------------
    # radial MLP (one hidden layer, normalized SiLU); norm consts folded in weights
    h = jnp.dot(emb_ref[...], w0_ref[...], preferred_element_type=jnp.float32)
    h = _SILU_NORM * (h * (1.0 / (1.0 + jnp.exp(-h))))
    w = jnp.dot(h, w1_ref[...], preferred_element_type=jnp.float32)       # (te, U)

    n_pad = x_ref.shape[0]
    te = src_ref.shape[0]

    # gather lin1(x)[edge_src]: (te, N) one-hot @ (N, U) on the MXU
    cols = jax.lax.broadcasted_iota(jnp.int32, (te, n_pad), 1)
    g = (cols == src_ref[...]).astype(jnp.float32)                        # src_ref (te,1)
    x_src = jnp.dot(g, x1_sc[...], preferred_element_type=jnp.float32)    # (te, U)

    ef = x_src * w                                                         # 'uvu' scalar TP

    # scatter-add over edge_dst; edge_attr and 1/sqrt(num_neighbors) folded into
    # the (N, te) scatter matrix (padded edges: dst == n_pad, ea == 0)
    rows = jax.lax.broadcasted_iota(jnp.int32, (n_pad, te), 0)
    s_mat = (rows == dst_ref[...]).astype(jnp.float32) * (ea_ref[...] * inv_sqrt_nn)
    acc_sc[...] += jnp.dot(s_mat, ef, preferred_element_type=jnp.float32)

    # ---- epilogue: lin2 + sin/cos combine -------------------------------------
    @pl.when(pl.program_id(0) == pl.num_programs(0) - 1)
    def _():
        x2 = _outer_concat(acc_sc[...], attr_ref[...])
        lin2 = jnp.dot(x2, wl2_ref[...], preferred_element_type=jnp.float32)
        o_ref[...] = (c_s * s_sc[...] + c_x * lin2).astype(o_ref.dtype)


# ------------------------------ Module wrapper ------------------------------ #

class Convolution:
    """JAX/Pallas port of e3nn gate_points_2101.Convolution (scalar irreps)."""

    def __init__(self, c_in, c_attr, c_edge, c_out, number_of_basis,
                 radial_layers, radial_neurons, num_neighbors, key):
        assert c_edge == 1, "edge attr restricted to 1x0e in this specialization"
        assert radial_layers == 1  # TODO(synk): generalize radial MLP kernel to >1 hidden layer
        self.c_in, self.c_attr, self.c_out = c_in, c_attr, c_out
        self.num_neighbors = float(num_neighbors)

        k = jax.random.split(key, 5)
        # canonical (V=c_attr, U, W_out) weights (used by the JAX reference) ...
        self.sc_w = jax.random.normal(k[0], (c_attr, c_in, c_out), jnp.float32)
        self.lin1_w = jax.random.normal(k[1], (c_attr, c_in, c_in), jnp.float32)
        self.lin2_w = jax.random.normal(k[2], (c_attr, c_in, c_out), jnp.float32)
        self.fc_w0 = jax.random.normal(k[3], (number_of_basis, radial_neurons), jnp.float32)
        self.fc_w1 = jax.random.normal(k[4], (radial_neurons, c_in), jnp.float32)

        # ... and pre-reshaped / pre-normalized copies so each FCTP is ONE K=V*U
        # MXU matmul and the radial MLP needs no in-kernel scaling.
        fctp_scale = 1.0 / math.sqrt(c_in * c_attr)
        self.sc_w2 = self.sc_w.reshape(c_attr * c_in, c_out) * fctp_scale
        self.lin1_w2 = self.lin1_w.reshape(c_attr * c_in, c_in) * fctp_scale
        self.lin2_w2 = self.lin2_w.reshape(c_attr * c_in, c_out) * fctp_scale
        self.fc_w0s = self.fc_w0 / math.sqrt(number_of_basis)
        self.fc_w1s = self.fc_w1 / math.sqrt(radial_neurons)

    def __call__(self, node_input, node_attr, edge_src, edge_dst,
                 edge_attr, edge_length_embedded):
        f32 = jnp.float32
        n_nodes = node_input.shape[0]
        n_edges = edge_src.shape[0]
        c_in, c_attr, c_out = self.c_in, self.c_attr, self.c_out
        nb, nh = self.fc_w0.shape

        # Edge tile: 256 edges/step keeps the per-tile one-hot matrices and the
        # double-buffered edge inputs well under the scoped VMEM budget even with
        # full node residency.  Nodes are not tiled (resident accumulator).
        n_pad = _round_up(n_nodes, 8)
        te = 256 if n_edges >= 256 else _round_up(n_edges, 8)
        e_pad = _round_up(n_edges, te)

        def pad_rows(a, rows):
            return a if a.shape[0] == rows else jnp.pad(a, ((0, rows - a.shape[0]), (0, 0)))

        x_in = pad_rows(node_input.astype(f32), n_pad)
        attr = pad_rows(node_attr.astype(f32), n_pad)
        emb = pad_rows(edge_length_embedded.astype(f32), e_pad)
        src_col = jnp.pad(edge_src.astype(jnp.int32),
                          (0, e_pad - n_edges)).reshape(e_pad, 1)
        dst_row = jnp.pad(edge_dst.astype(jnp.int32), (0, e_pad - n_edges),
                          constant_values=n_pad).reshape(1, e_pad)
        ea_row = jnp.pad(edge_attr.astype(f32).reshape(-1),
                         (0, e_pad - n_edges)).reshape(1, e_pad)

        c_s, c_x = math.sin(math.pi / 8), math.cos(math.pi / 8)

        out = pl.pallas_call(
            partial(_conv_kernel,
                    inv_sqrt_nn=1.0 / math.sqrt(self.num_neighbors),
                    c_s=c_s, c_x=c_x),
            out_shape=jax.ShapeDtypeStruct((n_pad, c_out), f32),
            grid=(e_pad // te,),
            in_specs=[pl.BlockSpec((te, nb), lambda e: (e, 0)),               # edge length emb
                      pl.BlockSpec((nb, nh), lambda e: (0, 0)),               # radial W0 (prescaled)
                      pl.BlockSpec((nh, c_in), lambda e: (0, 0)),             # radial W1 (prescaled)
                      pl.BlockSpec((n_pad, c_in), lambda e: (0, 0)),          # node input (resident)
                      pl.BlockSpec((n_pad, c_attr), lambda e: (0, 0)),        # node attr (resident)
                      pl.BlockSpec((c_attr * c_in, c_out), lambda e: (0, 0)), # sc weights
                      pl.BlockSpec((c_attr * c_in, c_in), lambda e: (0, 0)),  # lin1 weights
                      pl.BlockSpec((c_attr * c_in, c_out), lambda e: (0, 0)), # lin2 weights
                      pl.BlockSpec((te, 1), lambda e: (e, 0)),                # edge_src column
                      pl.BlockSpec((1, te), lambda e: (0, e)),                # edge_dst row
                      pl.BlockSpec((1, te), lambda e: (0, e))],               # edge_attr row
            out_specs=pl.BlockSpec((n_pad, c_out), lambda e: (0, 0)),         # resident output
            scratch_shapes=[pltpu.VMEM((n_pad, c_out), f32),   # s  = sc(x, attr)
                            pltpu.VMEM((n_pad, c_in), f32),    # x  = lin1(x, attr)
                            pltpu.VMEM((n_pad, c_in), f32)],   # scatter accumulator
            compiler_params=pltpu.CompilerParams(
                dimension_semantics=("arbitrary",),
                vmem_limit_bytes=64 * 1024 * 1024),
        )(emb, self.fc_w0s, self.fc_w1s, x_in, attr,
          self.sc_w2, self.lin1_w2, self.lin2_w2, src_col, dst_row, ea_row)

        return out[:n_nodes]


# ------------------------------ JAX reference ------------------------------- #

def reference_forward(conv, node_input, node_attr, edge_src, edge_dst,
                      edge_attr, edge_len_emb):
    h = edge_len_emb @ conv.fc_w0 / math.sqrt(conv.fc_w0.shape[0])
    h = _SILU_NORM * (h * jax.nn.sigmoid(h))
    weight = h @ conv.fc_w1 / math.sqrt(conv.fc_w1.shape[0])
    scale = 1.0 / math.sqrt(conv.c_in * conv.c_attr)

    def fctp(x, a, w):
        return jnp.einsum('nu,nv,vuw->nw', x, a, w) * scale

    s = fctp(node_input, node_attr, conv.sc_w)
    x = fctp(node_input, node_attr, conv.lin1_w)
    ef = x[edge_src] * edge_attr * weight
    agg = jnp.zeros((node_input.shape[0], conv.c_in), jnp.float32).at[edge_dst].add(ef)
    agg = agg / math.sqrt(conv.num_neighbors)
    x2 = fctp(agg, node_attr, conv.lin2_w)
    c_s, c_x = math.sin(math.pi / 8), math.cos(math.pi / 8)
    return c_s * s + c_x * x2


if __name__ == "__main__":
    key = jax.random.PRNGKey(0)
    k_node, k_attr, k_edge, k_len, k_src, k_dst, k_param = jax.random.split(key, 7)

    num_nodes, num_edges = 16, 32
    c_in, c_attr, c_out = 16, 8, 16
    number_of_basis, radial_layers, radial_neurons = 8, 1, 32
    num_neighbors = 3.0

    conv = Convolution(c_in, c_attr, 1, c_out, number_of_basis,
                       radial_layers, radial_neurons, num_neighbors, k_param)

    node_input = jax.random.normal(k_node, (num_nodes, c_in), jnp.float32)
    node_attr = jax.random.normal(k_attr, (num_nodes, c_attr), jnp.float32)
    edge_attr = jax.random.normal(k_edge, (num_edges, 1), jnp.float32)   # 1x0e
    edge_len_emb = jax.random.normal(k_len, (num_edges, number_of_basis), jnp.float32)
    edge_src = jax.random.randint(k_src, (num_edges,), 0, num_nodes, jnp.int32)
    edge_dst = jax.random.randint(k_dst, (num_edges,), 0, num_nodes, jnp.int32)

    out = conv(node_input, node_attr, edge_src, edge_dst, edge_attr, edge_len_emb)
    out = jax.block_until_ready(out)

    ref = reference_forward(conv, node_input, node_attr, edge_src, edge_dst,
                            edge_attr, edge_len_emb)
    assert out.shape == (num_nodes, c_out)
    assert bool(jnp.allclose(out, ref, rtol=1e-2, atol=1e-2)), "mismatch vs JAX reference"
    print("KERNEL_OK")
</pallas_src>

<mosaic_0001>
module attributes {stable_mosaic.version = 11 : i64} {
  func.func @_conv_kernel(%arg0: i32, %arg1: memref<32x8xf32, #tpu.memory_space<vmem>>, %arg2: memref<8x32xf32, #tpu.memory_space<vmem>>, %arg3: memref<32x16xf32, #tpu.memory_space<vmem>>, %arg4: memref<16x16xf32, #tpu.memory_space<vmem>>, %arg5: memref<16x8xf32, #tpu.memory_space<vmem>>, %arg6: memref<128x16xf32, #tpu.memory_space<vmem>>, %arg7: memref<128x16xf32, #tpu.memory_space<vmem>>, %arg8: memref<128x16xf32, #tpu.memory_space<vmem>>, %arg9: memref<32x1xi32, #tpu.memory_space<vmem>>, %arg10: memref<1x32xi32, #tpu.memory_space<vmem>>, %arg11: memref<1x32xf32, #tpu.memory_space<vmem>>, %arg12: memref<16x16xf32, #tpu.memory_space<vmem>>, %arg13: memref<16x16xf32, #tpu.memory_space<vmem>>, %arg14: memref<16x16xf32, #tpu.memory_space<vmem>>, %arg15: memref<16x16xf32, #tpu.memory_space<vmem>>) attributes {dimension_semantics = [#tpu.dimension_semantics<arbitrary>], iteration_bounds = array<i64: 1>, scalar_prefetch = 0 : i64, scratch_operands = 3 : i64, tpu.core_type = #tpu.core_type<tc>, window_params = [{transform_indices = @transform_0, window_bounds = array<i64: 32, 8>}, {pipeline_mode = #tpu.pipeline_mode<synchronous>, transform_indices = @transform_1, window_bounds = array<i64: 8, 32>}, {pipeline_mode = #tpu.pipeline_mode<synchronous>, transform_indices = @transform_2, window_bounds = array<i64: 32, 16>}, {pipeline_mode = #tpu.pipeline_mode<synchronous>, transform_indices = @transform_3, window_bounds = array<i64: 16, 16>}, {pipeline_mode = #tpu.pipeline_mode<synchronous>, transform_indices = @transform_4, window_bounds = array<i64: 16, 8>}, {pipeline_mode = #tpu.pipeline_mode<synchronous>, transform_indices = @transform_5, window_bounds = array<i64: 128, 16>}, {pipeline_mode = #tpu.pipeline_mode<synchronous>, transform_indices = @transform_6, window_bounds = array<i64: 128, 16>}, {pipeline_mode = #tpu.pipeline_mode<synchronous>, transform_indices = @transform_7, window_bounds = array<i64: 128, 16>}, {transform_indices = @transform_8, window_bounds = array<i64: 32, 1>}, {transform_indices = @transform_9, window_bounds = array<i64: 1, 32>}, {transform_indices = @transform_10, window_bounds = array<i64: 1, 32>}, {pipeline_mode = #tpu.pipeline_mode<synchronous>, transform_indices = @transform_11, window_bounds = array<i64: 16, 16>}]} {
    %c0_i32 = arith.constant 0 : i32
    %0 = arith.cmpi eq, %arg0, %c0_i32 : i32
    %1 = arith.extui %0 : i1 to i32
    %c0_i32_0 = arith.constant 0 : i32
    %2 = arith.cmpi ne, %1, %c0_i32_0 : i32
    scf.if %2 {
      %c0_28 = arith.constant 0 : index
      %c0_29 = arith.constant 0 : index
      %45 = vector.load %arg4[%c0_28, %c0_29] : memref<16x16xf32, #tpu.memory_space<vmem>>, vector<16x16xf32>
      %c0_30 = arith.constant 0 : index
      %c0_31 = arith.constant 0 : index
      %46 = vector.load %arg5[%c0_30, %c0_31] : memref<16x8xf32, #tpu.memory_space<vmem>>, vector<16x8xf32>
      %47 = vector.extract_strided_slice %46 {offsets = [0, 0], sizes = [16, 1], strides = [1, 1]} : vector<16x8xf32> to vector<16x1xf32>
      %48 = vector.broadcast %47 : vector<16x1xf32> to vector<16x16xf32>
      %49 = arith.mulf %45, %48 : vector<16x16xf32>
      %50 = vector.extract_strided_slice %46 {offsets = [0, 1], sizes = [16, 1], strides = [1, 1]} : vector<16x8xf32> to vector<16x1xf32>
      %51 = vector.broadcast %50 : vector<16x1xf32> to vector<16x16xf32>
      %52 = arith.mulf %45, %51 : vector<16x16xf32>
      %53 = vector.extract_strided_slice %46 {offsets = [0, 2], sizes = [16, 1], strides = [1, 1]} : vector<16x8xf32> to vector<16x1xf32>
      %54 = vector.broadcast %53 : vector<16x1xf32> to vector<16x16xf32>
      %55 = arith.mulf %45, %54 : vector<16x16xf32>
      %56 = vector.extract_strided_slice %46 {offsets = [0, 3], sizes = [16, 1], strides = [1, 1]} : vector<16x8xf32> to vector<16x1xf32>
      %57 = vector.broadcast %56 : vector<16x1xf32> to vector<16x16xf32>
      %58 = arith.mulf %45, %57 : vector<16x16xf32>
      %59 = vector.extract_strided_slice %46 {offsets = [0, 4], sizes = [16, 1], strides = [1, 1]} : vector<16x8xf32> to vector<16x1xf32>
      %60 = vector.broadcast %59 : vector<16x1xf32> to vector<16x16xf32>
      %61 = arith.mulf %45, %60 : vector<16x16xf32>
      %62 = vector.extract_strided_slice %46 {offsets = [0, 5], sizes = [16, 1], strides = [1, 1]} : vector<16x8xf32> to vector<16x1xf32>
      %63 = vector.broadcast %62 : vector<16x1xf32> to vector<16x16xf32>
      %64 = arith.mulf %45, %63 : vector<16x16xf32>
      %65 = vector.extract_strided_slice %46 {offsets = [0, 6], sizes = [16, 1], strides = [1, 1]} : vector<16x8xf32> to vector<16x1xf32>
      %66 = vector.broadcast %65 : vector<16x1xf32> to vector<16x16xf32>
      %67 = arith.mulf %45, %66 : vector<16x16xf32>
      %68 = vector.extract_strided_slice %46 {offsets = [0, 7], sizes = [16, 1], strides = [1, 1]} : vector<16x8xf32> to vector<16x1xf32>
      %69 = vector.broadcast %68 : vector<16x1xf32> to vector<16x16xf32>
      %70 = arith.mulf %45, %69 : vector<16x16xf32>
      %71 = tpu.concatenate %49, %52, %55, %58, %61, %64, %67, %70 in 1 : vector<16x16xf32>, vector<16x16xf32>, vector<16x16xf32>, vector<16x16xf32>, vector<16x16xf32>, vector<16x16xf32>, vector<16x16xf32>, vector<16x16xf32> -> vector<16x128xf32>
      %c0_32 = arith.constant 0 : index
      %c0_33 = arith.constant 0 : index
      %72 = vector.load %arg6[%c0_32, %c0_33] : memref<128x16xf32, #tpu.memory_space<vmem>>, vector<128x16xf32>
      %cst_34 = arith.constant dense<0.000000e+00> : vector<16x16xf32>
      %73 = tpu.matmul %71, %72, %cst_34 {dimension_numbers = #tpu.dot_dimension_numbers<[1], [0], [0], [1], [0, 0, 1, 1], [], []>} : vector<16x128xf32>, vector<128x16xf32>, vector<16x16xf32> -> vector<16x16xf32>
      %c0_35 = arith.constant 0 : index
      %c0_36 = arith.constant 0 : index
      %74 = vector.load %arg13[%c0_35, %c0_36] : memref<16x16xf32, #tpu.memory_space<vmem>>, vector<16x16xf32>
      tpu.vector_store %arg13[%c0_35, %c0_36], %73 {strides = array<i32>} : memref<16x16xf32, #tpu.memory_space<vmem>>, vector<16x16xf32>,
      %c0_37 = arith.constant 0 : index
      %c0_38 = arith.constant 0 : index
      %75 = vector.load %arg7[%c0_37, %c0_38] : memref<128x16xf32, #tpu.memory_space<vmem>>, vector<128x16xf32>
      %cst_39 = arith.constant dense<0.000000e+00> : vector<16x16xf32>
      %76 = tpu.matmul %71, %75, %cst_39 {dimension_numbers = #tpu.dot_dimension_numbers<[1], [0], [0], [1], [0, 0, 1, 1], [], []>} : vector<16x128xf32>, vector<128x16xf32>, vector<16x16xf32> -> vector<16x16xf32>
      %c0_40 = arith.constant 0 : index
      %c0_41 = arith.constant 0 : index
      %77 = vector.load %arg14[%c0_40, %c0_41] : memref<16x16xf32, #tpu.memory_space<vmem>>, vector<16x16xf32>
      tpu.vector_store %arg14[%c0_40, %c0_41], %76 {strides = array<i32>} : memref<16x16xf32, #tpu.memory_space<vmem>>, vector<16x16xf32>,
      %cst_42 = arith.constant 0.000000e+00 : f32
      %78 = vector.broadcast %cst_42 : f32 to vector<16x16xf32>
      %c0_43 = arith.constant 0 : index
      %c0_44 = arith.constant 0 : index
      %79 = vector.load %arg15[%c0_43, %c0_44] : memref<16x16xf32, #tpu.memory_space<vmem>>, vector<16x16xf32>
      tpu.vector_store %arg15[%c0_43, %c0_44], %78 {strides = array<i32>} : memref<16x16xf32, #tpu.memory_space<vmem>>, vector<16x16xf32>,
    } else {
    }
    %c0 = arith.constant 0 : index
    %c0_1 = arith.constant 0 : index
    %3 = vector.load %arg1[%c0, %c0_1] : memref<32x8xf32, #tpu.memory_space<vmem>>, vector<32x8xf32>
    %c0_2 = arith.constant 0 : index
    %c0_3 = arith.constant 0 : index
    %4 = vector.load %arg2[%c0_2, %c0_3] : memref<8x32xf32, #tpu.memory_space<vmem>>, vector<8x32xf32>
    %cst = arith.constant dense<0.000000e+00> : vector<32x32xf32>
    %5 = tpu.matmul %3, %4, %cst {dimension_numbers = #tpu.dot_dimension_numbers<[1], [0], [0], [1], [0, 0, 1, 1], [], []>} : vector<32x8xf32>, vector<8x32xf32>, vector<32x32xf32> -> vector<32x32xf32>
    %cst_4 = arith.constant 0.000000e+00 : f32
    %6 = vector.broadcast %cst_4 : f32 to vector<32x32xf32>
    %7 = arith.subf %6, %5 : vector<32x32xf32>
    %8 = math.exp %7 : vector<32x32xf32>
    %cst_5 = arith.constant 1.000000e+00 : f32
    %9 = vector.broadcast %cst_5 : f32 to vector<32x32xf32>
    %10 = arith.addf %9, %8 : vector<32x32xf32>
    %cst_6 = arith.constant 1.000000e+00 : f32
    %11 = vector.broadcast %cst_6 : f32 to vector<32x32xf32>
    %12 = arith.divf %11, %10 : vector<32x32xf32>
    %13 = arith.mulf %5, %12 : vector<32x32xf32>
    %cst_7 = arith.constant 1.679000e+00 : f32
    %14 = vector.broadcast %cst_7 : f32 to vector<32x32xf32>
    %15 = arith.mulf %14, %13 : vector<32x32xf32>
    %c0_8 = arith.constant 0 : index
    %c0_9 = arith.constant 0 : index
    %16 = vector.load %arg3[%c0_8, %c0_9] : memref<32x16xf32, #tpu.memory_space<vmem>>, vector<32x16xf32>
    %cst_10 = arith.constant dense<0.000000e+00> : vector<32x16xf32>
    %17 = tpu.matmul %15, %16, %cst_10 {dimension_numbers = #tpu.dot_dimension_numbers<[1], [0], [0], [1], [0, 0, 1, 1], [], []>} : vector<32x32xf32>, vector<32x16xf32>, vector<32x16xf32> -> vector<32x16xf32>
    %18 = tpu.iota {dimensions = array<i32: 1>} : vector<32x16xi32>
    %c0_11 = arith.constant 0 : index
    %c0_12 = arith.constant 0 : index
    %19 = vector.load %arg9[%c0_11, %c0_12] : memref<32x1xi32, #tpu.memory_space<vmem>>, vector<32x1xi32>
    %20 = vector.broadcast %19 : vector<32x1xi32> to vector<32x16xi32>
    %21 = arith.cmpi eq, %18, %20 : vector<32x16xi32>
    %22 = arith.extui %21 : vector<32x16xi1> to vector<32x16xi32>
    %23 = arith.sitofp %22 : vector<32x16xi32> to vector<32x16xf32>
    %c0_13 = arith.constant 0 : index
    %c0_14 = arith.constant 0 : index
    %24 = vector.load %arg14[%c0_13, %c0_14] : memref<16x16xf32, #tpu.memory_space<vmem>>, vector<16x16xf32>
    %cst_15 = arith.constant dense<0.000000e+00> : vector<32x16xf32>
    %25 = tpu.matmul %23, %24, %cst_15 {dimension_numbers = #tpu.dot_dimension_numbers<[1], [0], [0], [1], [0, 0, 1, 1], [], []>} : vector<32x16xf32>, vector<16x16xf32>, vector<32x16xf32> -> vector<32x16xf32>
    %26 = arith.mulf %25, %17 : vector<32x16xf32>
    %27 = tpu.iota {dimensions = array<i32: 0>} : vector<16x32xi32>
    %c0_16 = arith.constant 0 : index
    %c0_17 = arith.constant 0 : index
    %28 = vector.load %arg10[%c0_16, %c0_17] : memref<1x32xi32, #tpu.memory_space<vmem>>, vector<1x32xi32>
    %29 = vector.broadcast %28 : vector<1x32xi32> to vector<16x32xi32>
    %30 = arith.cmpi eq, %27, %29 : vector<16x32xi32>
    %31 = arith.extui %30 : vector<16x32xi1> to vector<16x32xi32>
    %32 = arith.sitofp %31 : vector<16x32xi32> to vector<16x32xf32>
    %c0_18 = arith.constant 0 : index
    %c0_19 = arith.constant 0 : index
    %33 = vector.load %arg11[%c0_18, %c0_19] : memref<1x32xf32, #tpu.memory_space<vmem>>, vector<1x32xf32>
    %cst_20 = arith.constant 0.577350259 : f32
    %34 = vector.broadcast %cst_20 : f32 to vector<1x32xf32>
    %35 = arith.mulf %33, %34 : vector<1x32xf32>
    %36 = vector.broadcast %35 : vector<1x32xf32> to vector<16x32xf32>
    %37 = arith.mulf %32, %36 : vector<16x32xf32>
    %c0_21 = arith.constant 0 : index
    %c0_22 = arith.constant 0 : index
    %38 = vector.load %arg15[%c0_21, %c0_22] : memref<16x16xf32, #tpu.memory_space<vmem>>, vector<16x16xf32>
    %cst_23 = arith.constant dense<0.000000e+00> : vector<16x16xf32>
    %39 = tpu.matmul %37, %26, %cst_23 {dimension_numbers = #tpu.dot_dimension_numbers<[1], [0], [0], [1], [0, 0, 1, 1], [], []>} : vector<16x32xf32>, vector<32x16xf32>, vector<16x16xf32> -> vector<16x16xf32>
    %40 = arith.addf %38, %39 : vector<16x16xf32>
    %c0_24 = arith.constant 0 : index
    %c0_25 = arith.constant 0 : index
    %41 = vector.load %arg15[%c0_24, %c0_25] : memref<16x16xf32, #tpu.memory_space<vmem>>, vector<16x16xf32>
    tpu.vector_store %arg15[%c0_24, %c0_25], %40 {strides = array<i32>} : memref<16x16xf32, #tpu.memory_space<vmem>>, vector<16x16xf32>,
    %c0_i32_26 = arith.constant 0 : i32
    %42 = arith.cmpi eq, %arg0, %c0_i32_26 : i32
    %43 = arith.extui %42 : i1 to i32
    %c0_i32_27 = arith.constant 0 : i32
    %44 = arith.cmpi ne, %43, %c0_i32_27 : i32
    scf.if %44 {
      %c0_28 = arith.constant 0 : index
      %c0_29 = arith.constant 0 : index
      %45 = vector.load %arg15[%c0_28, %c0_29] : memref<16x16xf32, #tpu.memory_space<vmem>>, vector<16x16xf32>
      %c0_30 = arith.constant 0 : index
      %c0_31 = arith.constant 0 : index
      %46 = vector.load %arg5[%c0_30, %c0_31] : memref<16x8xf32, #tpu.memory_space<vmem>>, vector<16x8xf32>
      %47 = vector.extract_strided_slice %46 {offsets = [0, 0], sizes = [16, 1], strides = [1, 1]} : vector<16x8xf32> to vector<16x1xf32>
      %48 = vector.broadcast %47 : vector<16x1xf32> to vector<16x16xf32>
      %49 = arith.mulf %45, %48 : vector<16x16xf32>
      %50 = vector.extract_strided_slice %46 {offsets = [0, 1], sizes = [16, 1], strides = [1, 1]} : vector<16x8xf32> to vector<16x1xf32>
      %51 = vector.broadcast %50 : vector<16x1xf32> to vector<16x16xf32>
      %52 = arith.mulf %45, %51 : vector<16x16xf32>
      %53 = vector.extract_strided_slice %46 {offsets = [0, 2], sizes = [16, 1], strides = [1, 1]} : vector<16x8xf32> to vector<16x1xf32>
      %54 = vector.broadcast %53 : vector<16x1xf32> to vector<16x16xf32>
      %55 = arith.mulf %45, %54 : vector<16x16xf32>
      %56 = vector.extract_strided_slice %46 {offsets = [0, 3], sizes = [16, 1], strides = [1, 1]} : vector<16x8xf32> to vector<16x1xf32>
      %57 = vector.broadcast %56 : vector<16x1xf32> to vector<16x16xf32>
      %58 = arith.mulf %45, %57 : vector<16x16xf32>
      %59 = vector.extract_strided_slice %46 {offsets = [0, 4], sizes = [16, 1], strides = [1, 1]} : vector<16x8xf32> to vector<16x1xf32>
      %60 = vector.broadcast %59 : vector<16x1xf32> to vector<16x16xf32>
      %61 = arith.mulf %45, %60 : vector<16x16xf32>
      %62 = vector.extract_strided_slice %46 {offsets = [0, 5], sizes = [16, 1], strides = [1, 1]} : vector<16x8xf32> to vector<16x1xf32>
      %63 = vector.broadcast %62 : vector<16x1xf32> to vector<16x16xf32>
      %64 = arith.mulf %45, %63 : vector<16x16xf32>
      %65 = vector.extract_strided_slice %46 {offsets = [0, 6], sizes = [16, 1], strides = [1, 1]} : vector<16x8xf32> to vector<16x1xf32>
      %66 = vector.broadcast %65 : vector<16x1xf32> to vector<16x16xf32>
      %67 = arith.mulf %45, %66 : vector<16x16xf32>
      %68 = vector.extract_strided_slice %46 {offsets = [0, 7], sizes = [16, 1], strides = [1, 1]} : vector<16x8xf32> to vector<16x1xf32>
      %69 = vector.broadcast %68 : vector<16x1xf32> to vector<16x16xf32>
      %70 = arith.mulf %45, %69 : vector<16x16xf32>
      %71 = tpu.concatenate %49, %52, %55, %58, %61, %64, %67, %70 in 1 : vector<16x16xf32>, vector<16x16xf32>, vector<16x16xf32>, vector<16x16xf32>, vector<16x16xf32>, vector<16x16xf32>, vector<16x16xf32>, vector<16x16xf32> -> vector<16x128xf32>
      %c0_32 = arith.constant 0 : index
      %c0_33 = arith.constant 0 : index
      %72 = vector.load %arg8[%c0_32, %c0_33] : memref<128x16xf32, #tpu.memory_space<vmem>>, vector<128x16xf32>
      %cst_34 = arith.constant dense<0.000000e+00> : vector<16x16xf32>
      %73 = tpu.matmul %71, %72, %cst_34 {dimension_numbers = #tpu.dot_dimension_numbers<[1], [0], [0], [1], [0, 0, 1, 1], [], []>} : vector<16x128xf32>, vector<128x16xf32>, vector<16x16xf32> -> vector<16x16xf32>
      %c0_35 = arith.constant 0 : index
      %c0_36 = arith.constant 0 : index
      %74 = vector.load %arg13[%c0_35, %c0_36] : memref<16x16xf32, #tpu.memory_space<vmem>>, vector<16x16xf32>
      %cst_37 = arith.constant 0.382683426 : f32
      %75 = vector.broadcast %cst_37 : f32 to vector<16x16xf32>
      %76 = arith.mulf %75, %74 : vector<16x16xf32>
      %cst_38 = arith.constant 0.923879504 : f32
      %77 = vector.broadcast %cst_38 : f32 to vector<16x16xf32>
      %78 = arith.mulf %77, %73 : vector<16x16xf32>
      %79 = arith.addf %76, %78 : vector<16x16xf32>
      %c0_39 = arith.constant 0 : index
      %c0_40 = arith.constant 0 : index
      %80 = vector.load %arg12[%c0_39, %c0_40] : memref<16x16xf32, #tpu.memory_space<vmem>>, vector<16x16xf32>
      tpu.vector_store %arg12[%c0_39, %c0_40], %79 {strides = array<i32>} : memref<16x16xf32, #tpu.memory_space<vmem>>, vector<16x16xf32>,
    } else {
    }
    return
  }
  func.func @transform_0(%arg0: i32) -> (i32, i32) {
    %c0_i32 = arith.constant 0 : i32
    %c0_i32_0 = arith.constant 0 : i32
    return %arg0, %c0_i32 : i32, i32
  }
  func.func @transform_1(%arg0: i32) -> (i32, i32) {
    %c0_i32 = arith.constant 0 : i32
    %c0_i32_0 = arith.constant 0 : i32
    %c0_i32_1 = arith.constant 0 : i32
    return %c0_i32, %c0_i32_0 : i32, i32
  }
  func.func @transform_2(%arg0: i32) -> (i32, i32) {
    %c0_i32 = arith.constant 0 : i32
    %c0_i32_0 = arith.constant 0 : i32
    %c0_i32_1 = arith.constant 0 : i32
    return %c0_i32, %c0_i32_0 : i32, i32
  }
  func.func @transform_3(%arg0: i32) -> (i32, i32) {
    %c0_i32 = arith.constant 0 : i32
    %c0_i32_0 = arith.constant 0 : i32
    %c0_i32_1 = arith.constant 0 : i32
    return %c0_i32, %c0_i32_0 : i32, i32
  }
  func.func @transform_4(%arg0: i32) -> (i32, i32) {
    %c0_i32 = arith.constant 0 : i32
    %c0_i32_0 = arith.constant 0 : i32
    %c0_i32_1 = arith.constant 0 : i32
    return %c0_i32, %c0_i32_0 : i32, i32
  }
  func.func @transform_5(%arg0: i32) -> (i32, i32) {
    %c0_i32 = arith.constant 0 : i32
    %c0_i32_0 = arith.constant 0 : i32
    %c0_i32_1 = arith.constant 0 : i32
    return %c0_i32, %c0_i32_0 : i32, i32
  }
  func.func @transform_6(%arg0: i32) -> (i32, i32) {
    %c0_i32 = arith.constant 0 : i32
    %c0_i32_0 = arith.constant 0 : i32
    %c0_i32_1 = arith.constant 0 : i32
    return %c0_i32, %c0_i32_0 : i32, i32
  }
  func.func @transform_7(%arg0: i32) -> (i32, i32) {
    %c0_i32 = arith.constant 0 : i32
    %c0_i32_0 = arith.constant 0 : i32
    %c0_i32_1 = arith.constant 0 : i32
    return %c0_i32, %c0_i32_0 : i32, i32
  }
  func.func @transform_8(%arg0: i32) -> (i32, i32) {
    %c0_i32 = arith.constant 0 : i32
    %c0_i32_0 = arith.constant 0 : i32
    return %arg0, %c0_i32 : i32, i32
  }
  func.func @transform_9(%arg0: i32) -> (i32, i32) {
    %c0_i32 = arith.constant 0 : i32
    %c0_i32_0 = arith.constant 0 : i32
    return %c0_i32, %arg0 : i32, i32
  }
  func.func @transform_10(%arg0: i32) -> (i32, i32) {
    %c0_i32 = arith.constant 0 : i32
    %c0_i32_0 = arith.constant 0 : i32
    return %c0_i32, %arg0 : i32, i32
  }
  func.func @transform_11(%arg0: i32) -> (i32, i32) {
    %c0_i32 = arith.constant 0 : i32
    %c0_i32_0 = arith.constant 0 : i32
    %c0_i32_1 = arith.constant 0 : i32
    return %c0_i32, %c0_i32_0 : i32, i32
  }
}

</mosaic_0001>

<bundles_post_ra>
// kernel: tpu_custom_call.1
= control target key start
LH: loop header
LB: loop body
LE: loop exit
PB: predicated region body
PF: predicated region fallthrough
CT: control target
= control target key end

     0   :  { %v1014_v1 = vmov 3   ;;  %v1015_v2 = vmov 1   ;;  %s1500_s0 = inlined_call_operand.vmem [shape: f32[32,8], index: 0, kind: input, shape index: {}]   ;;  %s1501_s1 = inlined_call_operand.vmem [shape: f32[8,32], index: 1, kind: input, shape index: {}]   ;;  %s1502_s2 = inlined_call_operand.vmem [shape: f32[32,16], index: 2, kind: input, shape index: {}]   ;;  %s1503_s3 = inlined_call_operand.vmem [shape: f32[16,16], index: 3, kind: input, shape index: {}]   ;;  %s1504_s4 = inlined_call_operand.vmem [shape: f32[16,8], index: 4, kind: input, shape index: {}]   ;;  %s1505_s5 = inlined_call_operand.vmem [shape: f32[128,16], index: 5, kind: input, shape index: {}]   ;;  %s1506_s6 = inlined_call_operand.vmem [shape: f32[128,16], index: 6, kind: input, shape index: {}]   ;;  %s1507_s7 = inlined_call_operand.vmem [shape: f32[128,16], index: 7, kind: input, shape index: {}]   ;;  %s1508_s8 = inlined_call_operand.vmem [shape: s32[32,1], index: 8, kind: input, shape index: {}]   ;;  %s1509_s9 = inlined_call_operand.vmem [shape: s32[1,32], index: 9, kind: input, shape index: {}]   ;;  %s1510_s10 = inlined_call_operand.vmem [shape: f32[1,32], index: 10, kind: input, shape index: {}]   ;;  %s1511_s11 = inlined_call_operand.hbm [shape: f32[16,16], index: 11, kind: output, shape index: {}]  }
   0x1   :  { %v1096_v0 = vld [vmem:[%s1504_s4] sm:$0xff]  ;;  %886 = vset.pattern.permute.xlu1 %v1014_v1  ;;  %884 = vset.pattern.permute.xlu0 %v1015_v2 }
   0x2   :  { %80 = vperm.xlu1 %886, %v1096_v0   ;;  %60 = vperm.xlu0 %884, %v1096_v0  }
   0x3   :  { %16 = vsyncpa [#allocation6], 0  ;;  %v1016_v3 = vmov 5   ;;  %v1017_v4 = vmov 4   ;;  %v1018_v5 = vmov 2   ;;  %v1019_v6 = vmov 6  }
   0x4   :  { %888 = vset.pattern.permute.xlu2 %v1016_v3  ;;  %v1113_v7 = vld [vmem:[%s1504_s4 + $0x8] sm:$0xff]  ;;  %v1020_v8 = vmov 7   ;;  %v1021_v9 = vmov 0   ;;  %v1142_v14 = vld [vmem:[%s1503_s3] sm:$0xff]  ;;  %s1022_s24 = smov 16   ;;  %s1024_s25 = smov 32  }
   0x5   :  { %100 = vperm.xlu2 %888, %v1096_v0   ;;  %v1137_v13 = vld [vmem:[%s1503_s3 + $0x8] sm:$0xff]  ;;  %s1023_s3 = smov 64   ;;  %s1025_s26 = smov 80   ;;  %v469_v45 = vld [vmem:[%s1508_s8] sm:$0xff]  ;;  %v472_v46 = vld [vmem:[%s1508_s8 + $0x18] sm:$0xff]  ;;  %vm295_vm0 = vcmask 64512  }
   0x6   :  { %s1026_s27 = smov 48   ;;  %s1027_s28 = smov 112   ;;  %v470_v44 = vld [vmem:[%s1508_s8 + $0x8] sm:$0xff]  ;;  %v294_v47 = vld [vmem:[%s1501_s1] sm:$0xff]  ;;  %v221_v50 = vld [vmem:[%s1505_s5 + $0x78] sm:$0xff]  ;;  %vm185_vm1 = vcmask 130048  }
   0x7   :  { %s1028_s29 = smov 96   ;;  %v290_v48 = vld [vmem:[%s1500_s0] sm:$0xff]  ;;  %323 = vmatpush.msra.mxu2 %v294_v47  ;;  %v291_v49 = vld [vmem:[%s1500_s0 + $0x8] sm:$0xff]  ;;  %v262_v51 = vld [vmem:[%s1506_s6 + $0x78] sm:$0xff]  ;;  %222 = vmatpush.msra.mxu0 %v221_v50  ;;  %vm188_vm2 = vcmask 261120   ;;  %vm191_vm3 = vcmask 392192  }
   0x8   :  { %829 = vmatmul.msk.f32.vlgmr.msra.gmra.mxu2 %vm295_vm0, %v290_v48  ;;  %263 = vmatpush.msra.mxu1 %v262_v51  ;;  %v220_v52 = vld [vmem:[%s1505_s5 + $0x70] sm:$0xff]  ;;  %v219_v54 = vld [vmem:[%s1505_s5 + $0x68] sm:$0xff]  ;;  %v218_v56 = vld [vmem:[%s1505_s5 + $0x60] sm:$0xff]  ;;  %vm194_vm4 = vcmask 523264   ;;  %vm197_vm5 = vcmask 654336   ;;  %vm200_vm6 = vcmask 785408  }
   0x9   :  { %v261_v53 = vld [vmem:[%s1506_s6 + $0x70] sm:$0xff]  ;;  %v260_v55 = vld [vmem:[%s1506_s6 + $0x68] sm:$0xff]  ;;  %223 = vmatpush.msra.mxu0 %v220_v52  ;;  %v259_v57 = vld [vmem:[%s1506_s6 + $0x60] sm:$0xff]  ;;  %vm203_vm7 = vcmask 916480  }
   0xa   :  { %887 = vset.pattern.permute.xlu1 %v1017_v4  ;;  %885 = vset.pattern.permute.xlu0 %v1018_v5  ;;  %v292_v58 = vld [vmem:[%s1500_s0 + $0x10] sm:$0xff]  ;;  %v217_v59 = vld [vmem:[%s1505_s5 + $0x58] sm:$0xff] }
   0xb   :  { %90 = vperm.xlu1 %887, %v1096_v0   ;;  %70 = vperm.xlu0 %885, %v1096_v0   ;;  %v258_v60 = vld [vmem:[%s1506_s6 + $0x58] sm:$0xff]  ;;  %v216_v61 = vld [vmem:[%s1505_s5 + $0x50] sm:$0xff] }
   0xc   :  { %264 = vmatpush.msra.mxu1 %v261_v53  ;;  %224 = vmatpush.msra.mxu0 %v219_v54  ;;  %v257_v62 = vld [vmem:[%s1506_s6 + $0x50] sm:$0xff]  ;;  %v293_v63 = vld [vmem:[%s1500_s0 + $0x18] sm:$0xff] }
   0xd   :  { %889 = vset.pattern.permute.xlu2 %v1019_v6 }
   0xe   :  { %110 = vperm.xlu2 %889, %v1096_v0   ;;  %265 = vmatpush.msra.mxu1 %v260_v55 }
   0xf   :  { %225 = vmatpush.msra.mxu0 %v218_v56 }
  0x10   :  { %830 = vmatmul.msk.f32.gmra.mxu2 %vm295_vm0, %v291_v49  ;;  %266 = vmatpush.msra.mxu1 %v259_v57 }
  0x11   :  { %226 = vmatpush.msra.mxu0 %v217_v59 }
  0x12   :  { %267 = vmatpush.msra.mxu1 %v258_v60 }
  0x13   :  { %890 = vset.pattern.permute.xlu1 %v1020_v8  ;;  %74 = vperm.xlu0 %885, %v1113_v7  }
  0x14   :  { %120 = vperm.xlu1 %890, %v1096_v0   ;;  %227 = vmatpush.msra.mxu0 %v216_v61 }
  0x15   :  { %268 = vmatpush.msra.mxu1 %v257_v62 }
  0x16   :  { %891 = vset.pattern.permute.xlu2 %v1015_v2 }
  0x17   :  { %64 = vperm.xlu2 %891, %v1113_v7  }
  0x18   :  { %831 = vmatmul.msk.f32.gmra.mxu2 %vm295_vm0, %v292_v58 }
  0x1b   :  { %894 = vset.pattern.permute.xlu0 %v1016_v3 }
  0x1c   :  { %892 = vset.pattern.permute.xlu1 %v1014_v1  ;;  %104 = vperm.xlu0 %894, %v1113_v7  }
  0x1d   :  { %84 = vperm.xlu1 %892, %v1113_v7  }
  0x1f   :  { %893 = vset.pattern.permute.xlu2 %v1017_v4 }
  0x20   :  { %94 = vperm.xlu2 %893, %v1113_v7   ;;  %832 = vmatmul.msk.f32.gmra.mxu2 %vm295_vm0, %v293_v63 }
  0x24   :  { %919 = vset.pattern.permute.xlu0 %v1021_v9 }
  0x25   :  { %895 = vset.pattern.permute.xlu1 %v1019_v6 }
  0x26   :  { %114 = vperm.xlu1 %895, %v1113_v7  }
  0x28   :  { %896 = vset.pattern.permute.xlu2 %v1020_v8 }
  0x29   :  { %124 = vperm.xlu2 %896, %v1113_v7  }
  0x2e   :  { %897 = vset.pattern.permute.xlu1 %v1021_v9 }
  0x2f   :  { %49 = vperm.xlu1 %897, %v1096_v0  }
  0x31   :  { %918 = vset.pattern.permute.xlu2 %v1021_v9 }
  0x5f   :  { %v101_v10 = vpop.permute.xlu2 %100 }
  0x60   :  { %v107_v32 = vmul.f32 %v101_v10, %v1142_v14  ;;  %v255_v10 = vld [vmem:[%s1506_s6 + $0x40] sm:$0xff] }
  0x68   :  { %v111_v11 = vpop.permute.xlu2 %110 }
  0x69   :  { %v117_v39 = vmul.f32 %v111_v11, %v1142_v14  ;;  %v213_v11 = vld [vmem:[%s1505_s5 + $0x38] sm:$0xff] }
  0x71   :  { %v65_v12 = vpop.permute.xlu2 %64 }
  0x72   :  { %v68_v15 = vmul.f32 %v65_v12, %v1137_v13  ;;  %v254_v12 = vld [vmem:[%s1506_s6 + $0x38] sm:$0xff] }
  0x74   :  { %v81_v16 = vpop.permute.xlu1 %80  ;;  %v61_v17 = vpop.permute.xlu0 %60 }
  0x75   :  { %v67_v18 = vmul.f32 %v61_v17, %v1142_v14  ;;  %v87_v33 = vmul.f32 %v81_v16, %v1142_v14  ;;  %v253_v16 = vld [vmem:[%s1506_s6 + $0x30] sm:$0xff]  ;;  %v211_v17 = vld [vmem:[%s1505_s5 + $0x28] sm:$0xff] }
  0x77   :  { %v898_v19 = vpack.i.bf16 %v68_v15, %v67_v18  ;;  %v212_v15 = vld [vmem:[%s1505_s5 + $0x30] sm:$0xff]  ;;  %v252_v18 = vld [vmem:[%s1506_s6 + $0x28] sm:$0xff] }
  0x79   :  { %899 = vrot.lane.b32.xlu2 %v898_v19, %s1022_s24  ;;  %v251_v19 = vld [vmem:[%s1506_s6 + $0x20] sm:$0xff] }
  0x7a   :  { %v95_v20 = vpop.permute.xlu2 %94 }
  0x7b   :  { %v98_v21 = vmul.f32 %v95_v20, %v1137_v13  ;;  %v209_v20 = vld [vmem:[%s1505_s5 + $0x18] sm:$0xff] }
  0x7d   :  { %v91_v22 = vpop.permute.xlu1 %90  ;;  %v71_v23 = vpop.permute.xlu0 %70 }
  0x7e   :  { %v97_v24 = vmul.f32 %v91_v22, %v1142_v14  ;;  %v77_v27 = vmul.f32 %v71_v23, %v1142_v14  ;;  %v208_v22 = vld [vmem:[%s1505_s5 + $0x10] sm:$0xff] }
  0x7f   :  { %v249_v23 = vld [vmem:[%s1506_s6 + $0x10] sm:$0xff] }
  0x80   :  { %v913_v25 = vpack.i.bf16 %v98_v21, %v97_v24  ;;  %v250_v21 = vld [vmem:[%s1506_s6 + $0x18] sm:$0xff]  ;;  %v207_v24 = vld [vmem:[%s1505_s5 + $0x8] sm:$0xff] }
  0x82   :  { %914 = vrot.lane.b32.xlu2 %v913_v25, %s1023_s3  ;;  %v248_v25 = vld [vmem:[%s1506_s6 + $0x8] sm:$0xff] }
  0x83   :  { %v125_v40 = vpop.permute.xlu2 %124 }
  0x84   :  { %v128_v42 = vmul.f32 %v125_v40, %v1137_v13  ;;  %v471_v40 = vld [vmem:[%s1508_s8 + $0x10] sm:$0xff] }
  0x85   :  { %v75_v26 = vpop.permute.xlu0 %74 }
  0x86   :  { %v78_v28 = vmul.f32 %v75_v26, %v1137_v13  ;;  %v121_v29 = vpop.permute.xlu1 %120  ;;  %v206_v26 = vld [vmem:[%s1505_s5] sm:$0xff] }
  0x87   :  { %v127_v36 = vmul.f32 %v121_v29, %v1142_v14 }
  0x88   :  { %v903_v30 = vpack.i.bf16 %v78_v28, %v77_v27  ;;  %v247_v27 = vld [vmem:[%s1506_s6] sm:$0xff]  ;;  %v1029_v28 = vmov 0.0  }
  0x89   :  { %288 = vst.msk [vmem:[#allocation4] sm:$0xff] %vm185_vm1, %v1029_v28 }
  0x8a   :  { %904 = vrot.lane.b32.xlu0 %v903_v30, %s1024_s25  ;;  %54 = vperm.xlu2 %918, %v1113_v7   ;;  %289 = vst.msk [vmem:[#allocation4 + $0x8] sm:$0xff] %vm185_vm1, %v1029_v28 }
  0x8e   :  { %v105_v41 = vpop.permute.xlu0 %104 }
  0x8f   :  { %v85_v31 = vpop.permute.xlu1 %84  ;;  %v108_v43 = vmul.f32 %v105_v41, %v1137_v13 }
  0x90   :  { %v88_v34 = vmul.f32 %v85_v31, %v1137_v13 }
  0x92   :  { %v908_v35 = vpack.i.bf16 %v88_v34, %v87_v33  ;;  %163 = vrot.lane.b32.xlu0 %v107_v32, %s1025_s26 }
  0x94   :  { %909 = vrot.lane.b32.xlu1 %v908_v35, %s1026_s27 }
  0x98   :  { %v115_v37 = vpop.permute.xlu1 %114 }
  0x99   :  { %v118_v38 = vmul.f32 %v115_v37, %v1137_v13 }
  0x9a   :  { %179 = vrot.lane.b32.xlu0 %v127_v36, %s1027_s28 }
  0x9b   :  { %173 = vrot.lane.b32.xlu2 %v118_v38, %s1028_s29 }
  0x9c   :  { %171 = vrot.lane.b32.xlu1 %v117_v39, %s1028_s29 }
  0xa1   :  { %v50_v30 = vpop.permute.xlu1 %49 }
  0xa2   :  { %181 = vrot.lane.b32.xlu0 %v128_v42, %s1027_s28  ;;  %v57_v33 = vmul.f32 %v50_v30, %v1142_v14  ;;  %v422_v30 = vld [vmem:[%s1502_s2 + $0x8] sm:$0xff] }
  0xa3   :  { %477 = vperm.xlu2 %918, %v470_v44  }
  0xa4   :  { %165 = vrot.lane.b32.xlu1 %v108_v43, %s1025_s26 }
  0xaa   :  { %480 = vperm.xlu0 %919, %v471_v40  }
  0xab   :  { %920 = vset.pattern.permute.xlu2 %v1015_v2 }
  0xac   :  { %474 = vperm.xlu1 %897, %v469_v45   ;;  %618 = vperm.xlu2 %920, %v1096_v0  }
  0xb2   :  { %923 = vset.pattern.permute.xlu0 %v1018_v5 }
  0xb3   :  { %632 = vperm.xlu0 %923, %v1113_v7  }
  0xb4   :  { %483 = vperm.xlu1 %897, %v472_v46   ;;  %922 = vset.pattern.permute.xlu2 %v1018_v5  ;;  %v325_v5 = vpop.f32.mrf.mxu2 }
  0xb5   :  { %628 = vperm.xlu2 %922, %v1096_v0   ;;  %v337_v63 = vsub.f32 0.0, %v325_v5 }
  0xbb   :  { %928 = vset.pattern.permute.xlu0 %v1016_v3 }
  0xbc   :  { %921 = vset.pattern.permute.xlu1 %v1015_v2  ;;  %v256_v2 = vld [vmem:[%s1506_s6 + $0x48] sm:$0xff]  ;;  %658 = vperm.xlu0 %928, %v1096_v0  }
  0xbd   :  { %622 = vperm.xlu1 %921, %v1113_v7   ;;  %925 = vset.pattern.permute.xlu2 %v1014_v1 }
  0xbe   :  { %642 = vperm.xlu2 %925, %v1113_v7   ;;  %269 = vmatpush.msra.mxu1 %v256_v2  ;;  %v1348_v2 = vpop.f32.mrf.mxu2 }
  0xc0   :  { %270 = vmatpush.msra.mxu1 %v255_v10 }
  0xc2   :  { %271 = vmatpush.msra.mxu1 %v254_v12 }
  0xc4   :  { %272 = vmatpush.msra.mxu1 %v253_v16  ;;  %933 = vset.pattern.permute.xlu0 %v1020_v8 }
  0xc5   :  { %924 = vset.pattern.permute.xlu1 %v1014_v1  ;;  %v215_v1 = vld [vmem:[%s1505_s5 + $0x48] sm:$0xff]  ;;  %682 = vperm.xlu0 %933, %v1113_v7  }
  0xc6   :  { %638 = vperm.xlu1 %924, %v1096_v0   ;;  %927 = vset.pattern.permute.xlu2 %v1017_v4 }
  0xc7   :  { %652 = vperm.xlu2 %927, %v1113_v7   ;;  %228 = vmatpush.msra.mxu0 %v215_v1  ;;  %v341_v1 = vmul.f32 1.442695, %v337_v63 }
  0xc8   :  { %273 = vmatpush.msra.mxu1 %v252_v18 }
  0xc9   :  { %972 = vpow2.f32 %v341_v1 }
  0xca   :  { %274 = vmatpush.msra.mxu1 %v251_v19 }
  0xcc   :  { %275 = vmatpush.msra.mxu1 %v250_v21 }
  0xce   :  { %926 = vset.pattern.permute.xlu1 %v1017_v4  ;;  %v214_v4 = vld [vmem:[%s1505_s5 + $0x40] sm:$0xff]  ;;  %276 = vmatpush.msra.mxu1 %v249_v23  ;;  %v424_v23 = vld [vmem:[%s1502_s2 + $0x18] sm:$0xff] }
  0xcf   :  { %648 = vperm.xlu1 %926, %v1096_v0   ;;  %930 = vset.pattern.permute.xlu2 %v1019_v6  ;;  %v973_v10 = vpop.eup %972 }
  0xd0   :  { %668 = vperm.xlu2 %930, %v1096_v0   ;;  %229 = vmatpush.msra.mxu0 %v214_v4  ;;  %v338_v4 = vsub.f32 0.0, %v1348_v2  ;;  %v349_v12 = vadd.f32 1.0, %v973_v10 }
  0xd1   :  { %277 = vmatpush.msra.mxu1 %v248_v25  ;;  %450 = vmatpush.msra.mxu3 %v424_v23 }
  0xd2   :  { %230 = vmatpush.msra.mxu0 %v213_v11  ;;  %v343_v11 = vmul.f32 1.442695, %v338_v4  ;;  %v364_v18 = vand.u32 2147483648, %v349_v12  ;;  %vm358_vm8 = vweird.f32 %v349_v12  ;;  %v362_v19 = vand.u32 2147483647, %v349_v12 }
  0xd3   :  { %278 = vmatpush.msra.mxu1 %v247_v27 }
  0xd4   :  { %231 = vmatpush.msra.mxu0 %v212_v15  ;;  %974 = vpow2.f32 %v343_v11  ;;  %vm363_vm11 = vcmp.eq.f32.partialorder %v362_v19, 8.507059e+37 }
  0xd5   :  { %976 = vrcp.f32 %v349_v12 }
  0xd6   :  { %232 = vmatpush.msra.mxu0 %v211_v17 }
  0xd7   :  { %929 = vset.pattern.permute.xlu1 %v1016_v3  ;;  %v1351_v3 = vpop.f32.mrf.mxu2 }
  0xd8   :  { %662 = vperm.xlu1 %929, %v1113_v7   ;;  %932 = vset.pattern.permute.xlu2 %v1020_v8 }
  0xd9   :  { %678 = vperm.xlu2 %932, %v1096_v0  }
  0xda   :  { %v975_v8 = vpop.eup %974 }
  0xdb   :  { %v350_v16 = vadd.f32 1.0, %v975_v8 }
  0xdd   :  { %vm373_vm12 = vweird.f32 %v350_v16  ;;  %v377_v40 = vand.u32 2147483647, %v350_v16 }
  0xdf   :  { %vm378_vm15 = vcmp.eq.f32.partialorder %v377_v40, 8.507059e+37 }
  0xe0   :  { %931 = vset.pattern.permute.xlu1 %v1019_v6  ;;  %v210_v6 = vld [vmem:[%s1505_s5 + $0x20] sm:$0xff] }
  0xe1   :  { %672 = vperm.xlu1 %931, %v1113_v7   ;;  %935 = vset.pattern.permute.xlu2 %v1021_v9 }
  0xe2   :  { %612 = vperm.xlu2 %935, %v1113_v7   ;;  %233 = vmatpush.msra.mxu0 %v210_v6  ;;  %v977_v7 = vpop.eup %976 }
  0xe3   :  { %v354_v17 = vmul.f32 %v977_v7, %v349_v12  ;;  %vm359_vm9 = vweird.f32 %v977_v7 }
  0xe4   :  { %234 = vmatpush.msra.mxu0 %v209_v20  ;;  %v1354_v20 = vpop.f32.mrf.mxu2  ;;  %vm1363_vm10 = vmor %vm358_vm8, %vm359_vm9 }
  0xe5   :  { %v355_v6 = vsub.f32 1.0, %v354_v17  ;;  %v467_v17 = vlaneseq }
  0xe6   :  { %235 = vmatpush.msra.mxu0 %v208_v22  ;;  %v340_v22 = vsub.f32 0.0, %v1354_v20 }
  0xe7   :  { %v356_v21 = vmul.f32 %v977_v7, %v355_v6  ;;  %v468_v6 = vand.u32 127, %v467_v17 }
  0xe8   :  { %236 = vmatpush.msra.mxu0 %v207_v24  ;;  %v423_v24 = vld [vmem:[%s1502_s2 + $0x10] sm:$0xff] }
  0xe9   :  { %934 = vset.pattern.permute.xlu1 %v1021_v9  ;;  %v900_v9 = vpop.permute.xlu2 %899  ;;  %451 = vmatpush.msra.mxu3 %v423_v24 }
  0xea   :  { %607 = vperm.xlu1 %934, %v1096_v0   ;;  %237 = vmatpush.msra.mxu0 %v206_v26  ;;  %v901_v32 = vunpack.i.l.bf16 %v900_v9  ;;  %v902_v49 = vunpack.i.h.bf16 %v900_v9  ;;  %v339_v0 = vsub.f32 0.0, %v1351_v3  ;;  %v365_v26 = vor.u32 1.1754944e-38, %v364_v18 }
  0xeb   :  { %v357_v9 = vadd.f32 %v977_v7, %v356_v21  ;;  %452 = vmatpush.msra.mxu3 %v422_v30 }
  0xec   :  { %v186_v37 = vsel %vm185_vm1, %v57_v33, %v901_v32  ;;  %v345_v15 = vmul.f32 1.442695, %v339_v0 }
  0xed   :  { %v361_v33 = vsel %vm1363_vm10, %v977_v7, %v357_v9 }
  0xee   :  { %978 = vpow2.f32 %v345_v15 }
  0xef   :  { %980 = vrcp.f32 %v350_v16 }
  0xf1   :  { %v915_v31 = vpop.permute.xlu2 %914 }
  0xf2   :  { %v916_v41 = vunpack.i.l.bf16 %v915_v31  ;;  %v917_v55 = vunpack.i.h.bf16 %v915_v31 }
  0xf4   :  { %v979_v27 = vpop.eup %978 }
  0xf5   :  { %v981_v31 = vpop.eup %980  ;;  %v351_v32 = vadd.f32 1.0, %v979_v27 }
  0xf6   :  { %vm374_vm13 = vweird.f32 %v981_v31 }
  0xf7   :  { %vm375_vm14 = vmor %vm373_vm12, %vm374_vm13  ;;  %vm388_vm0 = vweird.f32 %v351_v32 }
  0xf9   :  { %v55_v14 = vpop.permute.xlu2 %54 }
  0xfa   :  { %v58_v44 = vmul.f32 %v55_v14, %v1137_v13 }
  0xfc   :  { %v905_v29 = vpop.permute.xlu0 %904  ;;  %v187_v53 = vsel %vm185_vm1, %v58_v44, %v902_v49 }
  0xfd   :  { %v906_v34 = vunpack.i.l.bf16 %v905_v29  ;;  %v907_v45 = vunpack.i.h.bf16 %v905_v29  ;;  %v347_v29 = vmul.f32 1.442695, %v340_v22 }
  0xff   :  { %v189_v39 = vsel %vm188_vm2, %v186_v37, %v906_v34  ;;  %v190_v54 = vsel %vm188_vm2, %v187_v53, %v907_v45  ;;  %v369_v34 = vmul.f32 %v981_v31, %v350_v16  ;;  %982 = vpow2.f32 %v347_v29 }
 0x100   :  { %v379_v37 = vand.u32 2147483648, %v350_v16  ;;  %984 = vrcp.f32 %v351_v32  ;;  %v392_v53 = vand.u32 2147483647, %v351_v32 }
 0x101   :  { %v174_v59 = vpop.permute.xlu2 %173 }
 0x102   :  { %v380_v14 = vor.u32 1.1754944e-38, %v379_v37  ;;  %vm393_vm10 = vcmp.eq.f32.partialorder %v392_v53, 8.507059e+37  ;;  %v563_v53 = vld [vmem:[#allocation4] sm:$0xff] }
 0x104   :  { %v164_v35 = vpop.permute.xlu0 %163 }
 0x106   :  { %v910_v36 = vpop.permute.xlu1 %909 }
 0x107   :  { %v911_v38 = vunpack.i.l.bf16 %v910_v36  ;;  %v912_v50 = vunpack.i.h.bf16 %v910_v36  ;;  %v366_v36 = vsel %vm363_vm11, %v365_v26, %v361_v33 }
 0x109   :  { %v192_v42 = vsel %vm191_vm3, %v189_v39, %v911_v38  ;;  %v193_v13 = vsel %vm191_vm3, %v190_v54, %v912_v50  ;;  %v413_v38 = vmul.f32 %v366_v36, %v325_v5  ;;  %v370_v39 = vsub.f32 1.0, %v369_v34  ;;  %v478_v22 = vpop.permute.xlu2 %477  ;;  %v556_v34 = vld [vmem:[%s1510_s10] sm:$0x1] }
 0x10a   :  { %v195_v43 = vsel %vm194_vm4, %v192_v42, %v916_v41  ;;  %v196_v57 = vsel %vm194_vm4, %v193_v13, %v917_v55  ;;  %v394_v50 = vand.u32 2147483648, %v351_v32  ;;  %v971_v36 = vld [vmem:[%s1509_s9] ss:$0 sm:$0xff]  ;;  %v557_v37 = vmul.f32 0.57735026, %v556_v34  ;;  %v772_v34 = vld [vmem:[%s1507_s7 + $0x50] sm:$0xff] }
 0x10b   :  { %v198_v48 = vsel %vm197_vm5, %v195_v43, %v164_v35  ;;  %v421_v35 = vld [vmem:[%s1502_s2] sm:$0xff]  ;;  %v417_v41 = vmul.f32 1.679, %v413_v38  ;;  %v371_v42 = vmul.f32 %v981_v31, %v370_v39  ;;  %v983_v43 = vpop.eup %982 }
 0x10c   :  { %v180_v46 = vpop.permute.xlu0 %179  ;;  %453 = vmatpush.msra.mxu3 %v421_v35  ;;  %v985_v45 = vpop.eup %984  ;;  %v395_v55 = vor.u32 1.1754944e-38, %v394_v50  ;;  %v546_v35 = vshrl.u32 %v467_v17, 7 }
 0x10d   :  { %v372_v44 = vadd.f32 %v981_v31, %v371_v42  ;;  %833 = vmatmul.msk.f32.vlgmr.msra.gmra.mxu3 %vm188_vm2, %v417_v41  ;;  %vm389_vm8 = vweird.f32 %v985_v45  ;;  %v559_v41 = vperm.slane %v557_v37, 0  ;;  %v769_v37 = vld [vmem:[%s1507_s7 + $0x38] sm:$0xff] }
 0x10e   :  { %v172_v47 = vpop.permute.xlu1 %171  ;;  %vm390_vm9 = vmor %vm388_vm0, %vm389_vm8  ;;  %vm486_vm0 = vcmp.eq.s32.totalorder %v468_v6, %v478_v22 }
 0x10f   :  { %v201_v51 = vsel %vm200_vm6, %v198_v48, %v172_v47  ;;  %v376_v47 = vsel %vm375_vm14, %v981_v31, %v372_v44  ;;  %v384_v48 = vmul.f32 %v985_v45, %v351_v32  ;;  %v838_v23 = vsel %vm486_vm0, 1.0, %v1029_v28 }
 0x110   :  { %v204_v52 = vsel %vm203_vm7, %v201_v51, %v180_v46  ;;  %v352_v46 = vadd.f32 1.0, %v983_v43  ;;  %v381_v49 = vsel %vm378_vm15, %v380_v14, %v376_v47  ;;  %v547_v43 = vadd.s32 8, %v546_v35 }
 0x111   :  { %238 = vmatmul.f32.vlgmr.msra.gmra.mxu0 %v204_v52  ;;  %279 = vmatmul.f32.vlgmr.msra.gmra.mxu1 %v204_v52  ;;  %v414_v51 = vmul.f32 %v381_v49, %v1348_v2  ;;  %v385_v52 = vsub.f32 1.0, %v384_v48  ;;  %v619_v49 = vpop.permute.xlu2 %618 }
 0x112   :  { %986 = vrcp.f32 %v352_v46  ;;  %vm403_vm11 = vweird.f32 %v352_v46  ;;  %v407_v63 = vand.u32 2147483647, %v352_v46 }
 0x113   :  { %v418_v54 = vmul.f32 1.679, %v414_v51  ;;  %v386_v13 = vmul.f32 %v985_v45, %v385_v52 }
 0x114   :  { %v182_v58 = vpop.permute.xlu0 %181  ;;  %vm408_vm14 = vcmp.eq.f32.partialorder %v407_v63, 8.507059e+37 }
 0x115   :  { %834 = vmatmul.msk.f32.gmra.mxu3 %vm188_vm2, %v418_v54 }
 0x116   :  { %v166_v56 = vpop.permute.xlu1 %165 }
 0x117   :  { %v199_v60 = vsel %vm197_vm5, %v196_v57, %v166_v56  ;;  %v387_v56 = vadd.f32 %v985_v45, %v386_v13 }
 0x118   :  { %v202_v61 = vsel %vm200_vm6, %v199_v60, %v174_v59  ;;  %v987_v57 = vpop.eup %986 }
 0x119   :  { %v205_v62 = vsel %vm203_vm7, %v202_v61, %v182_v58  ;;  %v391_v58 = vsel %vm390_vm9, %v985_v45, %v387_v56  ;;  %v399_v59 = vmul.f32 %v987_v57, %v352_v46  ;;  %v409_v61 = vand.u32 2147483648, %v352_v46  ;;  %v629_v51 = vpop.permute.xlu2 %628 }
 0x11a   :  { %241 = vmatmul.f32.gmra.mxu0 %v205_v62  ;;  %282 = vmatmul.f32.gmra.mxu1 %v205_v62  ;;  %v396_v60 = vsel %vm393_vm10, %v395_v55, %v391_v58  ;;  %vm404_vm12 = vweird.f32 %v987_v57  ;;  %vm550_vm10 = vcmp.eq.s32.totalorder %v546_v35, %v971_v36  ;;  %v771_v35 = vld [vmem:[%s1507_s7 + $0x48] sm:$0xff] }
 0x11b   :  { %v415_v62 = vmul.f32 %v396_v60, %v1351_v3  ;;  %v400_v5 = vsub.f32 1.0, %v399_v59  ;;  %vm405_vm13 = vmor %vm403_vm11, %vm404_vm12  ;;  %v410_v4 = vor.u32 1.1754944e-38, %v409_v61  ;;  %v845_v14 = vsel %vm550_vm10, 1.0, %v1029_v28 }
 0x11c   :  { %v481_v24 = vpop.permute.xlu0 %480  ;;  %v561_v45 = vmul.f32 %v845_v14, %v559_v41  ;;  %vm551_vm11 = vcmp.eq.s32.totalorder %v547_v43, %v971_v36  ;;  %v770_v36 = vld [vmem:[%s1507_s7 + $0x40] sm:$0xff]  ;;  %v763_v14 = vld [vmem:[%s1507_s7 + $0x8] sm:$0xff] }
 0x11d   :  { %v419_v1 = vmul.f32 1.679, %v415_v62  ;;  %v401_v2 = vmul.f32 %v987_v57, %v400_v5  ;;  %vm487_vm8 = vcmp.eq.s32.totalorder %v468_v6, %v481_v24  ;;  %v846_v47 = vsel %vm551_vm11, 1.0, %v1029_v28  ;;  %v762_v43 = vld [vmem:[%s1507_s7] sm:$0xff] }
 0x11e   :  { %v475_v18 = vpop.permute.xlu1 %474  ;;  %v839_v25 = vsel %vm487_vm8, 1.0, %v1029_v28  ;;  %v562_v48 = vmul.f32 %v846_v47, %v559_v41  ;;  %v765_v41 = vld [vmem:[%s1507_s7 + $0x18] sm:$0xff] }
 0x11f   :  { %v402_v10 = vadd.f32 %v987_v57, %v401_v2  ;;  %835 = vmatmul.msk.f32.gmra.mxu3 %vm188_vm2, %v419_v1  ;;  %vm485_vm15 = vcmp.eq.s32.totalorder %v468_v6, %v475_v18 }
 0x120   :  { %v837_v21 = vsel %vm485_vm15, 1.0, %v1029_v28 }
 0x121   :  { %v406_v11 = vsel %vm405_vm13, %v987_v57, %v402_v10  ;;  %v643_v55 = vpop.permute.xlu2 %642  ;;  %v564_v57 = vld [vmem:[#allocation4 + $0x8] sm:$0xff] }
 0x122   :  { %v411_v12 = vsel %vm408_vm14, %v410_v4, %v406_v11 }
 0x123   :  { %v416_v0 = vmul.f32 %v411_v12, %v1354_v20 }
 0x125   :  { %v420_v8 = vmul.f32 1.679, %v416_v0 }
 0x126   :  { %v484_v26 = vpop.permute.xlu1 %483 }
 0x127   :  { %836 = vmatmul.msk.f32.gmra.mxu3 %vm188_vm2, %v420_v8  ;;  %vm488_vm9 = vcmp.eq.s32.totalorder %v468_v6, %v484_v26 }
 0x128   :  { %v840_v27 = vsel %vm488_vm9, 1.0, %v1029_v28  ;;  %v633_v28 = vpop.permute.xlu0 %632 }
 0x129   :  { %v653_v60 = vpop.permute.xlu2 %652 }
 0x12f   :  { %v623_v50 = vpop.permute.xlu1 %622 }
 0x130   :  { %v659_v8 = vpop.permute.xlu0 %658 }
 0x138   :  { %v639_v52 = vpop.permute.xlu1 %638  ;;  %v683_v24 = vpop.permute.xlu0 %682 }
 0x141   :  { %v649_v56 = vpop.permute.xlu1 %648 }
 0x14a   :  { %v663_v61 = vpop.permute.xlu1 %662 }
 0x18e   :  { %v239_v15 = vpop.f32.mrf.mxu0  ;;  %v280_v3 = vpop.f32.mrf.mxu1 }
 0x18f   :  { %245 = vst.msk [vmem:[#allocation2] sm:$0xff] %vm185_vm1, %v239_v15 }
 0x190   :  { %286 = vst.msk [vmem:[#allocation3] sm:$0xff] %vm185_vm1, %v280_v3  ;;  %v455_v9 = vpop.f32.mrf.mxu3  ;;  %v669_v3 = vpop.permute.xlu2 %668 }
 0x197   :  { %v242_v7 = vpop.f32.mrf.mxu0  ;;  %v283_v16 = vpop.f32.mrf.mxu1  ;;  %v497_v20 = vld [vmem:[#allocation3] sm:$0xff] }
 0x198   :  { %246 = vst.msk [vmem:[#allocation2 + $0x8] sm:$0xff] %vm185_vm1, %v242_v7  ;;  %v458_v30 = vpop.f32.mrf.mxu3  ;;  %v673_v7 = vpop.permute.xlu1 %672 }
 0x199   :  { %287 = vst.msk [vmem:[#allocation3 + $0x8] sm:$0xff] %vm185_vm1, %v283_v16 }
 0x1a0   :  { %v498_v19 = vld [vmem:[#allocation3 + $0x8] sm:$0xff] }
 0x1a1   :  { %526 = vmatpush.msrb.mxu2 %v498_v19 }
 0x1a2   :  { %v461_v32 = vpop.f32.mrf.mxu3 }
 0x1a3   :  { %527 = vmatpush.msrb.mxu2 %v497_v20 }
 0x1a4   :  { %841 = vmatmul.msk.f32.vlgmr.msrb.gmra.mxu2 %vm185_vm1, %v837_v21 }
 0x1aa   :  { %v464_v38 = vpop.f32.mrf.mxu3 }
 0x1ac   :  { %842 = vmatmul.msk.f32.gmra.mxu2 %vm185_vm1, %v838_v23 }
 0x1b4   :  { %843 = vmatmul.msk.f32.gmra.mxu2 %vm185_vm1, %v839_v25  ;;  %v679_v25 = vpop.permute.xlu2 %678 }
 0x1bc   :  { %844 = vmatmul.msk.f32.gmra.mxu2 %vm185_vm1, %v840_v27 }
 0x227   :  { %v529_v29 = vpop.f32.mrf.mxu2 }
 0x228   :  { %v541_v46 = vmul.f32 %v529_v29, %v455_v9  ;;  %v777_v29 = vld [vmem:[%s1507_s7 + $0x78] sm:$0xff] }
 0x229   :  { %778 = vmatpush.msrb.mxu0 %v777_v29  ;;  %849 = vmatpush.msrb.mxu1 %v777_v29 }
 0x22f   :  { %v532_v31 = vpop.f32.mrf.mxu2 }
 0x230   :  { %v542_v44 = vmul.f32 %v532_v31, %v458_v30  ;;  %v776_v30 = vld [vmem:[%s1507_s7 + $0x70] sm:$0xff]  ;;  %v775_v31 = vld [vmem:[%s1507_s7 + $0x68] sm:$0xff] }
 0x231   :  { %779 = vmatpush.msrb.mxu0 %v776_v30  ;;  %850 = vmatpush.msrb.mxu1 %v776_v30 }
 0x233   :  { %780 = vmatpush.msrb.mxu0 %v775_v31  ;;  %851 = vmatpush.msrb.mxu1 %v775_v31 }
 0x237   :  { %v535_v33 = vpop.f32.mrf.mxu2 }
 0x238   :  { %v543_v42 = vmul.f32 %v535_v33, %v461_v32  ;;  %v774_v32 = vld [vmem:[%s1507_s7 + $0x60] sm:$0xff]  ;;  %v773_v33 = vld [vmem:[%s1507_s7 + $0x58] sm:$0xff] }
 0x239   :  { %781 = vmatpush.msrb.mxu0 %v774_v32  ;;  %852 = vmatpush.msrb.mxu1 %v774_v32 }
 0x23b   :  { %782 = vmatpush.msrb.mxu0 %v773_v33  ;;  %853 = vmatpush.msrb.mxu1 %v773_v33 }
 0x23d   :  { %783 = vmatpush.msrb.mxu0 %v772_v34  ;;  %854 = vmatpush.msrb.mxu1 %v772_v34 }
 0x23f   :  { %v538_v39 = vpop.f32.mrf.mxu2  ;;  %784 = vmatpush.msrb.mxu0 %v771_v35  ;;  %855 = vmatpush.msrb.mxu1 %v771_v35 }
 0x240   :  { %v544_v40 = vmul.f32 %v538_v39, %v464_v38  ;;  %v768_v38 = vld [vmem:[%s1507_s7 + $0x30] sm:$0xff]  ;;  %v767_v39 = vld [vmem:[%s1507_s7 + $0x28] sm:$0xff] }
 0x241   :  { %785 = vmatpush.msrb.mxu0 %v770_v36  ;;  %856 = vmatpush.msrb.mxu1 %v770_v36 }
 0x242   :  { %583 = vmatpush.msrb.mxu3 %v544_v40  ;;  %v766_v40 = vld [vmem:[%s1507_s7 + $0x20] sm:$0xff] }
 0x243   :  { %786 = vmatpush.msrb.mxu0 %v769_v37  ;;  %857 = vmatpush.msrb.mxu1 %v769_v37 }
 0x244   :  { %584 = vmatpush.msrb.mxu3 %v543_v42  ;;  %v764_v42 = vld [vmem:[%s1507_s7 + $0x10] sm:$0xff]  ;;  %s1030_s7 = smov [#allocation5]  }
 0x245   :  { %787 = vmatpush.msrb.mxu0 %v768_v38  ;;  %858 = vmatpush.msrb.mxu1 %v768_v38 }
 0x246   :  { %585 = vmatpush.msrb.mxu3 %v542_v44  ;;  %v608_v44 = vpop.permute.xlu1 %607 }
 0x247   :  { %788 = vmatpush.msrb.mxu0 %v767_v39  ;;  %859 = vmatpush.msrb.mxu1 %v767_v39 }
 0x248   :  { %586 = vmatpush.msrb.mxu3 %v541_v46 }
 0x249   :  { %847 = vmatmul.msk.f32.vlgmr.msrb.gmra.mxu3 %vm188_vm2, %v561_v45  ;;  %789 = vmatpush.msrb.mxu0 %v766_v40  ;;  %v613_v45 = vpop.permute.xlu2 %612 }
 0x24a   :  { %860 = vmatpush.msrb.mxu1 %v766_v40 }
 0x24b   :  { %790 = vmatpush.msrb.mxu0 %v765_v41 }
 0x24c   :  { %861 = vmatpush.msrb.mxu1 %v765_v41 }
 0x24d   :  { %791 = vmatpush.msrb.mxu0 %v764_v42 }
 0x24e   :  { %862 = vmatpush.msrb.mxu1 %v764_v42 }
 0x24f   :  { %792 = vmatpush.msrb.mxu0 %v763_v14 }
 0x250   :  { %863 = vmatpush.msrb.mxu1 %v763_v14 }
 0x251   :  { %848 = vmatmul.msk.f32.gmra.mxu3 %vm188_vm2, %v562_v48  ;;  %793 = vmatpush.msrb.mxu0 %v762_v43 }
 0x252   :  { %864 = vmatpush.msrb.mxu1 %v762_v43 }
 0x2cc   :  { %v588_v54 = vpop.f32.mrf.mxu3 }
 0x2cd   :  { %v594_v13 = vadd.f32 %v588_v54, %v563_v53 }
 0x2cf   :  { %596 = vst.msk [vmem:[#allocation4] sm:$0xff] %vm185_vm1, %v594_v13 }
 0x2d4   :  { %v591_v58 = vpop.f32.mrf.mxu3 }
 0x2d5   :  { %v595_v59 = vadd.f32 %v591_v58, %v564_v57 }
 0x2d6   :  { %v1406_v62 = vld [vmem:[#allocation4] sm:$0xff] }
 0x2d7   :  { %597 = vst.msk [vmem:[#allocation4 + $0x8] sm:$0xff] %vm185_vm1, %v595_v59  ;;  %v635_v63 = vmul.f32 %v629_v51, %v1406_v62  ;;  %v645_v1 = vmul.f32 %v639_v52, %v1406_v62  ;;  %v625_v10 = vmul.f32 %v619_v49, %v1406_v62  ;;  %v665_v6 = vmul.f32 %v659_v8, %v1406_v62 }
 0x2d8   :  { %v675_v19 = vmul.f32 %v669_v3, %v1406_v62  ;;  %v655_v20 = vmul.f32 %v649_v56, %v1406_v62  ;;  %v685_v27 = vmul.f32 %v679_v25, %v1406_v62 }
 0x2de   :  { %v1408_v5 = vld [vmem:[#allocation4 + $0x8] sm:$0xff] }
 0x2df   :  { %v646_v2 = vmul.f32 %v643_v55, %v1408_v5  ;;  %v636_v4 = vmul.f32 %v633_v28, %v1408_v5  ;;  %v626_v11 = vmul.f32 %v623_v50, %v1408_v5  ;;  %v666_v16 = vmul.f32 %v663_v61, %v1408_v5 }
 0x2e0   :  { %v676_v17 = vmul.f32 %v673_v7, %v1408_v5  ;;  %v656_v18 = vmul.f32 %v653_v60, %v1408_v5  ;;  %v686_v26 = vmul.f32 %v683_v24, %v1408_v5  ;;  %v615_v50 = vmul.f32 %v608_v44, %v1406_v62 }
 0x2e1   :  { %v946_v12 = vpack.i.bf16 %v646_v2, %v645_v1  ;;  %v941_v0 = vpack.i.bf16 %v636_v4, %v635_v63  ;;  %v936_v15 = vpack.i.bf16 %v626_v11, %v625_v10  ;;  %v956_v21 = vpack.i.bf16 %v666_v16, %v665_v6 }
 0x2e2   :  { %v961_v22 = vpack.i.bf16 %v676_v17, %v675_v19  ;;  %v951_v23 = vpack.i.bf16 %v656_v18, %v655_v20  ;;  %v966_v9 = vpack.i.bf16 %v686_v26, %v685_v27  ;;  %v616_v51 = vmul.f32 %v613_v45, %v1408_v5  ;;  %v801_v20 = vld [vmem:[#allocation2] sm:$0xff] }
 0x2e3   :  { %947 = vrot.lane.b32.xlu0 %v946_v12, %s1026_s27  ;;  %942 = vrot.lane.b32.xlu2 %v941_v0, %s1024_s25  ;;  %s815_s25 = sshll.u32 %s1030_s7, 4  ;;  %s817_s27 = sshll.u32 %s1511_s11, 4  ;;  %s816_s25 = int_to_ptr.vmem [resolvable:$true] %s815_s25  ;;  %s818_s27 = int_to_ptr.hbm [resolvable:$true] %s817_s27 }
 0x2e4   :  { %937 = vrot.lane.b32.xlu1 %v936_v15, %s1022_s24 }
 0x2eb   :  { %962 = vrot.lane.b32.xlu0 %v961_v22, %s1028_s29  ;;  %957 = vrot.lane.b32.xlu2 %v956_v21, %s1025_s26  ;;  %v802_v21 = vld [vmem:[#allocation2 + $0x8] sm:$0xff]  ;;  %s1031_s29 = smov 128  }
 0x2ec   :  { %952 = vrot.lane.b32.xlu1 %v951_v23, %s1023_s3  ;;  %v803_v23 = vmul.f32 0.38268343, %v801_v20  ;;  %v804_v26 = vmul.f32 0.38268343, %v802_v21 }
 0x2f4   :  { %967 = vrot.lane.b32.xlu1 %v966_v9, %s1027_s28  ;;  %s1032_s28 = smov 8  }
 0x33d   :  { %v943_v46 = vpop.permute.xlu2 %942 }
 0x33e   :  { %v945_v13 = vunpack.i.h.bf16 %v943_v46  ;;  %v944_v55 = vunpack.i.l.bf16 %v943_v46 }
 0x345   :  { %v958_v63 = vpop.permute.xlu2 %957 }
 0x346   :  { %v960_v4 = vunpack.i.h.bf16 %v958_v63  ;;  %v959_v10 = vunpack.i.l.bf16 %v958_v63 }
 0x355   :  { %v948_v52 = vpop.permute.xlu0 %947 }
 0x356   :  { %v938_v47 = vpop.permute.xlu1 %937  ;;  %v950_v59 = vunpack.i.h.bf16 %v948_v52  ;;  %v949_v28 = vunpack.i.l.bf16 %v948_v52 }
 0x357   :  { %v940_v48 = vunpack.i.h.bf16 %v938_v47  ;;  %v939_v49 = vunpack.i.l.bf16 %v938_v47 }
 0x359   :  { %v743_v53 = vsel %vm185_vm1, %v615_v50, %v939_v49  ;;  %v744_v54 = vsel %vm185_vm1, %v616_v51, %v940_v48 }
 0x35a   :  { %v745_v56 = vsel %vm188_vm2, %v743_v53, %v944_v55  ;;  %v746_v57 = vsel %vm188_vm2, %v744_v54, %v945_v13 }
 0x35b   :  { %v748_v62 = vsel %vm191_vm3, %v745_v56, %v949_v28  ;;  %v749_v5 = vsel %vm191_vm3, %v746_v57, %v950_v59 }
 0x35d   :  { %v963_v11 = vpop.permute.xlu0 %962 }
 0x35e   :  { %v953_v58 = vpop.permute.xlu1 %952  ;;  %v965_v8 = vunpack.i.h.bf16 %v963_v11  ;;  %v964_v15 = vunpack.i.l.bf16 %v963_v11 }
 0x35f   :  { %v955_v60 = vunpack.i.h.bf16 %v953_v58  ;;  %v954_v61 = vunpack.i.l.bf16 %v953_v58 }
 0x361   :  { %v751_v1 = vsel %vm194_vm4, %v748_v62, %v954_v61  ;;  %v752_v2 = vsel %vm194_vm4, %v749_v5, %v955_v60 }
 0x362   :  { %v754_v12 = vsel %vm197_vm5, %v751_v1, %v959_v10  ;;  %v755_v0 = vsel %vm197_vm5, %v752_v2, %v960_v4 }
 0x363   :  { %v757_v17 = vsel %vm200_vm6, %v754_v12, %v964_v15  ;;  %v758_v18 = vsel %vm200_vm6, %v755_v0, %v965_v8 }
 0x366   :  { %v968_v3 = vpop.permute.xlu1 %967 }
 0x367   :  { %v970_v7 = vunpack.i.h.bf16 %v968_v3  ;;  %v969_v16 = vunpack.i.l.bf16 %v968_v3 }
 0x369   :  { %v760_v6 = vsel %vm203_vm7, %v757_v17, %v969_v16  ;;  %v761_v19 = vsel %vm203_vm7, %v758_v18, %v970_v7 }
 0x36a   :  { %794 = vmatmul.f32.vlgmr.msrb.gmra.mxu0 %v760_v6  ;;  %797 = vmatmul.f32.vlgmr.msrb.gmra.mxu1 %v761_v19 }
 0x3e7   :  { %v795_v22 = vpop.f32.mrf.mxu0  ;;  %v798_v24 = vpop.f32.mrf.mxu1 }
 0x3e8   :  { %v805_v25 = vmul.f32 0.9238795, %v795_v22  ;;  %v806_v27 = vmul.f32 0.9238795, %v798_v24 }
 0x3ea   :  { %v807_v9 = vadd.f32 %v805_v25, %v803_v23  ;;  %v808_v29 = vadd.f32 %v806_v27, %v804_v26 }
 0x3ec   :  { %809 = vst.msk [vmem:[#allocation5] sm:$0xff] %vm185_vm1, %v807_v9 }
 0x3ed   :  { %810 = vst.msk [vmem:[#allocation5 + $0x8] sm:$0xff] %vm185_vm1, %v808_v29 }
 0x3ee   :  { %823 = dma.vmem_to_hbm [thread:$0]  %s816_s25, 256, %s818_s27, [#allocation6], %s1031_s29, %s1031_s29, %s1032_s28  }
 0x3ef   :  { %1012 = dma.done.wait [#allocation6], 256  }
 0x3f0   :  { %1013 = vsyncadd [#allocation6], 4294967040 }
 0x3f1   :  { %828 = vsyncpa [#allocation6], 1 }

</bundles_post_ra>
